<compile_context>
chip_gen: v7x
topology: tpu7x:2x2x1
jax: 0.10.0
libtpu: 0.0.40
codegen_flags: <defaults>
</compile_context>

<pallas_src>
import functools

import jax
import jax.numpy as jnp
from jax.experimental import pallas as pl
from jax.experimental.pallas import tpu as pltpu


def _pad_kernel(x_ref, o_ref, *, pad):
    """One grid step: padded volumes for BC consecutive (n, c) pairs.

    x_ref: (BC, D,      H,      W)       input volumes
    o_ref: (BC, D+2p,   H+2p,   W+2p)    output volumes
    """
    p = pad
    x = x_ref[...]
    bc, D, H, W = x.shape
    dt = o_ref.dtype
    W_out = W + 2 * p
    H_out = H + 2 * p

    # Circular pad along W (lane axis): one in-register concatenate.
    xw = jnp.concatenate([x[..., W - p:], x, x[..., :p]], axis=-1).astype(dt)
    # Zero pad along H (sublane axis).
    zh = jnp.zeros((bc, D, p, W_out), dt)
    xh = jnp.concatenate([zh, xw, zh], axis=2)
    # Zero pad along D, then ONE full-width store of the whole padded block.
    zd = jnp.zeros((bc, p, H_out, W_out), dt)
    o_ref[...] = jnp.concatenate([zd, xh, zd], axis=1)


def _ceil_to(v, m):
    return -(-v // m) * m


def make_custom_pad3d(padding_type: str, kern_size: int):
    if padding_type != 'Cons':
        raise RuntimeError('ERROR - NO Padding style given!!!')
    pad = int((kern_size - 1) / 2)

    def forward(x):
        N, C, D, H, W = x.shape
        p = pad
        if p == 0:
            # kern_size == 1: both pads are no-ops; avoid zero-size slices.
            return x
        if p > W:
            raise ValueError(
                f"circular pad size {p} must be <= W={W} (PyTorch constraint)")

        D_out, H_out, W_out = D + 2 * p, H + 2 * p, W + 2 * p
        NC = N * C
        x4 = x.reshape(NC, D, H, W)

        itemsize = jnp.dtype(x.dtype).itemsize
        # Tiled VMEM footprint of ONE (n, c) volume (input + output blocks):
        # second-to-last dim rounds up to the packed sublane count
        # (8 for 4-byte, 16 for 2-byte, 32 for 1-byte), last dim to 128 lanes.
        sublane = max(8, 32 // itemsize)
        per_ch = (D * _ceil_to(H, sublane) * _ceil_to(W, 128)
                  + D_out * _ceil_to(H_out, sublane) * _ceil_to(W_out, 128)
                  ) * itemsize

        # Generation-aware VMEM budget (v5e/v6e: 128 MiB, v7x: 64 MiB per TC).
        try:
            vmem_cap = pltpu.get_tpu_info().vmem_capacity_bytes
        except Exception:
            vmem_cap = 64 * 1024 * 1024
        vmem_budget = int(0.75 * vmem_cap)   # headroom for Mosaic scratch

        # 2x for double-buffered in+out blocks, 2x margin for in-register /
        # intermediate concatenate buffers.
        bc_max = max(1, vmem_budget // (4 * per_ch))
        # Keep the parallel grid axis >= 2 so v7x's two TensorCores both work.
        bc_cap = min(bc_max, NC if NC < 2 else max(1, NC // 2))
        # Largest divisor of NC that fits the budget (avoids ragged edge block).
        bc = 1
        for d in range(1, int(bc_cap) + 1):
            if NC % d == 0:
                bc = d
        # TODO(synk): if a single (n, c) volume's tiled blocks exceed the VMEM
        # budget (bc_max == 1 and still too big, e.g. huge D on v7x), chunk the
        # D axis (grid=(NC, cdiv(D, D_blk))) with pl.when-gated halo planes,
        # and/or present a lane-dense flattened (H_out*W_out) output slab.

        vmem_limit = min(vmem_budget, max(4 * per_ch * bc, 16 * 1024 * 1024))

        total_bytes = (NC * D * H * W + NC * D_out * H_out * W_out) * itemsize
        kernel = functools.partial(_pad_kernel, pad=p)

        out4 = pl.pallas_call(
            kernel,
            out_shape=jax.ShapeDtypeStruct((NC, D_out, H_out, W_out), x.dtype),
            grid_spec=pltpu.PrefetchScalarGridSpec(
                num_scalar_prefetch=0,
                grid=(NC // bc,),
                in_specs=[
                    pl.BlockSpec((bc, D, H, W), lambda i: (i, 0, 0, 0)),
                ],
                out_specs=pl.BlockSpec((bc, D_out, H_out, W_out),
                                       lambda i: (i, 0, 0, 0)),
            ),
            compiler_params=pltpu.CompilerParams(
                dimension_semantics=("parallel",),
                vmem_limit_bytes=int(vmem_limit),
            ),
            cost_estimate=pl.CostEstimate(
                flops=0, transcendentals=0, bytes_accessed=int(total_bytes)),
        )(x4)

        return out4.reshape(N, C, D_out, H_out, W_out)

    return forward


def _reference(x, pad):
    p = pad
    xw = jnp.concatenate([x[..., -p:], x, x[..., :p]], axis=-1)    # circular W
    return jnp.pad(xw, ((0, 0), (0, 0), (p, p), (p, p), (0, 0)))   # zero D, H


if __name__ == "__main__":
    kern_size = 3               # -> pad = 1
    N, C, D, H, W = 2, 4, 6, 6, 8

    key = jax.random.PRNGKey(0)
    x = jax.random.normal(key, (N, C, D, H, W), dtype=jnp.float32)

    pad3d = make_custom_pad3d('Cons', kern_size)
    y = jax.block_until_ready(pad3d(x))

    y_ref = _reference(x, (kern_size - 1) // 2)
    assert y.shape == y_ref.shape, (y.shape, y_ref.shape)
    assert jnp.allclose(y, y_ref), "mismatch vs reference"

    print("KERNEL_OK")
</pallas_src>

<mosaic_0001>
module attributes {stable_mosaic.version = 11 : i64} {
  func.func @_pad_kernel(%arg0: i32, %arg1: memref<4x6x6x8xf32, #tpu.memory_space<vmem>>, %arg2: memref<4x8x8x10xf32, #tpu.memory_space<vmem>>) attributes {dimension_semantics = [#tpu.dimension_semantics<parallel>], iteration_bounds = array<i64: 2>, scalar_prefetch = 0 : i64, scratch_operands = 0 : i64, tpu.core_type = #tpu.core_type<tc>, window_params = [{transform_indices = @transform_0, window_bounds = array<i64: 4, 6, 6, 8>}, {transform_indices = @transform_1, window_bounds = array<i64: 4, 8, 8, 10>}]} {
    %c0 = arith.constant 0 : index
    %c0_0 = arith.constant 0 : index
    %c0_1 = arith.constant 0 : index
    %c0_2 = arith.constant 0 : index
    %0 = vector.load %arg1[%c0, %c0_0, %c0_1, %c0_2] : memref<4x6x6x8xf32, #tpu.memory_space<vmem>>, vector<4x6x6x8xf32>
    %1 = vector.extract_strided_slice %0 {offsets = [0, 0, 0, 7], sizes = [4, 6, 6, 1], strides = [1, 1, 1, 1]} : vector<4x6x6x8xf32> to vector<4x6x6x1xf32>
    %2 = vector.extract_strided_slice %0 {offsets = [0, 0, 0, 0], sizes = [4, 6, 6, 1], strides = [1, 1, 1, 1]} : vector<4x6x6x8xf32> to vector<4x6x6x1xf32>
    %3 = tpu.concatenate %1, %0, %2 in 3 : vector<4x6x6x1xf32>, vector<4x6x6x8xf32>, vector<4x6x6x1xf32> -> vector<4x6x6x10xf32>
    %cst = arith.constant 0.000000e+00 : f32
    %4 = vector.broadcast %cst : f32 to vector<4x6x1x10xf32>
    %5 = tpu.concatenate %4, %3, %4 in 2 : vector<4x6x1x10xf32>, vector<4x6x6x10xf32>, vector<4x6x1x10xf32> -> vector<4x6x8x10xf32>
    %cst_3 = arith.constant 0.000000e+00 : f32
    %6 = vector.broadcast %cst_3 : f32 to vector<4x1x8x10xf32>
    %7 = tpu.concatenate %6, %5, %6 in 1 : vector<4x1x8x10xf32>, vector<4x6x8x10xf32>, vector<4x1x8x10xf32> -> vector<4x8x8x10xf32>
    %c0_4 = arith.constant 0 : index
    %c0_5 = arith.constant 0 : index
    %c0_6 = arith.constant 0 : index
    %c0_7 = arith.constant 0 : index
    %8 = vector.load %arg2[%c0_4, %c0_5, %c0_6, %c0_7] : memref<4x8x8x10xf32, #tpu.memory_space<vmem>>, vector<4x8x8x10xf32>
    tpu.vector_store %arg2[%c0_4, %c0_5, %c0_6, %c0_7], %7 {strides = array<i32>} : memref<4x8x8x10xf32, #tpu.memory_space<vmem>>, vector<4x8x8x10xf32>,
    return
  }
  func.func @transform_0(%arg0: i32) -> (i32, i32, i32, i32) {
    %c0_i32 = arith.constant 0 : i32
    %c0_i32_0 = arith.constant 0 : i32
    %c0_i32_1 = arith.constant 0 : i32
    %c0_i32_2 = arith.constant 0 : i32
    return %arg0, %c0_i32, %c0_i32_0, %c0_i32_1 : i32, i32, i32, i32
  }
  func.func @transform_1(%arg0: i32) -> (i32, i32, i32, i32) {
    %c0_i32 = arith.constant 0 : i32
    %c0_i32_0 = arith.constant 0 : i32
    %c0_i32_1 = arith.constant 0 : i32
    %c0_i32_2 = arith.constant 0 : i32
    return %arg0, %c0_i32, %c0_i32_0, %c0_i32_1 : i32, i32, i32, i32
  }
}

</mosaic_0001>

<bundles_post_ra>
// kernel: tpu_custom_call.1
= control target key start
LH: loop header
LB: loop body
LE: loop exit
PB: predicated region body
PF: predicated region fallthrough
CT: control target
= control target key end

     0   :  { %6 = vsyncpa [#allocation3], 0  ;;  %s1392_s0 = inlined_call_operand.vmem [shape: f32[8,6,6,8], index: 0, kind: input, shape index: {}]   ;;  %s1393_s1 = inlined_call_operand.hbm [shape: f32[8,8,8,10], index: 1, kind: output, shape index: {}]  }
   0x1   :  { %8 = vsyncpa [#allocation3 + $0x1], 0  ;;  %s809_s6 = smov 0   ;;  %s811_s7 = smov 0  }
   0x2   :  { %s813_s8 = smov 0   ;;  %s815_s9 = smov 0  }
   0x3 LB: > { %s830_s10 = sadd.s32 4294967295, %s790_s9   ;;  %s667_s11 = sadd.s32 4294967294, %s790_s9   ;;  %s790_s9 = sphi %s815_s9, %s1399_s9   ;;  %s786_s8 = sphi %s813_s8, %s1398_s8   ;;  %s782_s7 = sphi %s811_s7, %s1397_s7   ;;  %s778_s6 = sphi %s809_s6, %s1396_s6  }
   0x4   : > { %s834_s12 = sadd.s32 1, %s790_s9   ;;  %s47_s13 = sadd.s32 1, %s786_s8 }
   0x5   : > { %s44_s14 = ssub.s32 %s790_s9, %s834_s12  ;;  %p57_p0 = scmp.ne.s32.totalorder %s786_s8, %s782_s7 }
   0x6   : > { %p45_p1 = scmp.eq.s32.totalorder %s44_s14, 0  ;;  %p58_p2 = scmp.eq.s32.totalorder %s830_s10, 1 }
   0x7   : > { %p63_p3 = scmp.ne.s32.totalorder %s782_s7, %s778_s6  ;;  %p64_p4 = scmp.eq.s32.totalorder %s667_s11, 1 }
   0x8   : > { %s845_s15 = scalar_select %p45_p1, %s786_s8, %s47_s13  }
   0x9   : > { %p847_p5 = por %p58_p2, %p57_p0  ;;  %p851_p6 = por %p64_p4, %p63_p3 }
   0xa   : > { %p670_p7 = scmp.ge.s32.totalorder %s790_s9, 1  ;;  %p92_p8 = scmp.lt.s32.totalorder %s790_s9, 3 }
   0xc   : > { %p93_p9 = pnand %p670_p7, %p92_p8 }
   0xd   : > { %s672_s18 = sshll.u32 (!%p93_p9), %s830_s10, 2  ;;  %s792_s23 = smov (!%p93_p9), 121   ;;  %vm557_vm0 = vcmask (!%p93_p9), 80896   ;;  %v795_v34 = vmov (!%p93_p9), 0.0   ;;  %vm385_vm1 = vcmask (!%p93_p9), 7168   ;;  %vm410_vm2 = vcmask (!%p93_p9), 72704  }
   0xe   : > { %96 = sbr.rel (%p93_p9) target bundleno = 301 (0x12d), region = 24  ;;  %p114_p10 = scmp.lt.s32.totalorder (!%p93_p9), %s672_s18, 7  ;;  %vm507_vm3 = vcmask (!%p93_p9), 1040384   ;;  %vm532_vm4 = vcmask (!%p93_p9), 1046528  }
   0xf   : > { %s793_s24 = smov (!%p93_p9), 1   ;;  %s794_s25 = smov (!%p93_p9), 9  }
  0x10   : > { %s110_s26 = sand.u32 (!%p93_p9), 1, %s782_s7   ;;  %s681_s29 = sshll.u32 (!%p93_p9), %s830_s10, 12 }
  0x11   : > { %s671_s27 = sshll.u32 (!%p93_p9), %s110_s26, 8  ;;  %s1337_s4 = scalar_lea.hbm (!%p93_p9), %s1393_s1, %s681_s29 }
  0x12   : > { %s1070_s28 = scalar_lea.vmem (!%p93_p9), [#allocation2], %s671_s27  ;;  %s1351_s5 = scalar_lea.sflag (!%p93_p9), [#allocation3], %s110_s26 }
  0x13   : > { %558 = vst.msk [vmem:[%s1070_s28] sm:$0xff] (!%p93_p9), %vm557_vm0, %v795_v34  ;;  %565 = vst.msk [vmem:[%s1070_s28 + $0x38] sm:$0xff] (!%p93_p9), %vm557_vm0, %v795_v34  ;;  %s605_s30 = sshll.u32 (!%p93_p9), %s1070_s28, 4  ;;  %s796_s11 = smov (!%p93_p9), [#allocation2]   ;;  %s1339_s30 = int_to_ptr.vmem [resolvable:$true] %s605_s30 }
  0x14   : > { %566 = vst.msk [vmem:[%s1070_s28 + $0x40] sm:$0xff] (!%p93_p9), %vm557_vm0, %v795_v34  ;;  %573 = vst.msk [vmem:[%s1070_s28 + $0x78] sm:$0xff] (!%p93_p9), %vm557_vm0, %v795_v34  ;;  %s728_s10 = scalar_lea.vmem (!%p93_p9), %s1339_s30, 4096  ;;  %s732_s13 = sshll.u32 (!%p93_p9), %s796_s11, 4  ;;  %s733_s13 = int_to_ptr.vmem [resolvable:$false] %s732_s13 }
  0x15   : > { %s1401_s18 = smov (!%p114_p10, %s672_s18), 7  ;;  %574 = vst.msk [vmem:[%s1070_s28 + $0x80] sm:$0xff] %vm557_vm0, %v795_v34  ;;  %581 = vst.msk [vmem:[%s1070_s28 + $0xb8] sm:$0xff] %vm557_vm0, %v795_v34  ;;  %p729_p11 = scmp.ne.s32.totalorder %s1339_s30, %s728_s10 }
  0x16   : > { %s682_s19 = smul.u32 48, %s1401_s18  ;;  %582 = vst.msk [vmem:[%s1070_s28 + $0xc0] sm:$0xff] %vm557_vm0, %v795_v34  ;;  %589 = vst.msk [vmem:[%s1070_s28 + $0xf8] sm:$0xff] %vm557_vm0, %v795_v34  ;;  %s734_s14 = scalar_lea.vmem %s733_s13, 8192 }
  0x17   : > { %p730_p12 = pnand %p729_p11, %p847_p5  ;;  %p735_p0 = scmp.lt.s32.totalorder %s1339_s30, %s733_s13 }
  0x18   : > { %s861_s22 = scalar_lea.vmem %s1392_s0, %s682_s19  ;;  %p736_p1 = scmp.lt.s32.totalorder %s734_s14, %s728_s10 }
  0x19   : > { %v864_v0 = vld [vmem:[%s861_s22 + $0x10] sm:$0x3f]  ;;  %v867_v1 = vld [vmem:[%s861_s22] sm:$0x3f]  ;;  %v874_v2 = vld [vmem:[%s861_s22 + $0x18] sm:$0x3f]  ;;  %p731_p13 = pneg %p730_p12 }
  0x1a   : > { %173 = vrot.lane.b32.xlu1 %v864_v0, %s792_s23  ;;  %169 = vrot.lane.b32.xlu0 %v867_v1, %s792_s23  ;;  %v877_v3 = vld [vmem:[%s861_s22 + $0x8] sm:$0x3f]  ;;  %v887_v5 = vld [vmem:[%s861_s22 + $0x20] sm:$0x3f]  ;;  %p737_p2 = por %p736_p1, %p735_p0 }
  0x1b   : > { %v884_v4 = vld [vmem:[%s861_s22 + $0x28] sm:$0x3f]  ;;  %v894_v6 = vld [vmem:[%s861_s22 + $0x38] sm:$0x3f]  ;;  %v897_v7 = vld [vmem:[%s861_s22 + $0x30] sm:$0x3f] }
  0x1c   : > { %v904_v8 = vld [vmem:[%s861_s22 + $0x48] sm:$0x3f]  ;;  %v907_v9 = vld [vmem:[%s861_s22 + $0x40] sm:$0x3f]  ;;  %v914_v10 = vld [vmem:[%s861_s22 + $0x58] sm:$0x3f]  ;;  %p738_p3 = pnand %p737_p2, %p731_p13 }
  0x1d   : > { %v917_v11 = vld [vmem:[%s861_s22 + $0x50] sm:$0x3f]  ;;  %v924_v12 = vld [vmem:[%s861_s22 + $0x68] sm:$0x3f]  ;;  %v927_v13 = vld [vmem:[%s861_s22 + $0x60] sm:$0x3f] }
  0x1e   : > { %175 = vrot.lane.b32.xlu1 %v874_v2, %s792_s23  ;;  %171 = vrot.lane.b32.xlu0 %v877_v3, %s792_s23  ;;  %v934_v14 = vld [vmem:[%s861_s22 + $0x78] sm:$0x3f]  ;;  %v937_v15 = vld [vmem:[%s861_s22 + $0x70] sm:$0x3f] }
  0x1f   : > { %v944_v16 = vld [vmem:[%s861_s22 + $0x88] sm:$0x3f]  ;;  %v947_v17 = vld [vmem:[%s861_s22 + $0x80] sm:$0x3f]  ;;  %v954_v18 = vld [vmem:[%s861_s22 + $0x98] sm:$0x3f] }
  0x20   : > { %v957_v19 = vld [vmem:[%s861_s22 + $0x90] sm:$0x3f]  ;;  %v964_v20 = vld [vmem:[%s861_s22 + $0xa8] sm:$0x3f]  ;;  %v967_v21 = vld [vmem:[%s861_s22 + $0xa0] sm:$0x3f] }
  0x21   : > { %v974_v22 = vld [vmem:[%s861_s22 + $0xb8] sm:$0x3f]  ;;  %v977_v23 = vld [vmem:[%s861_s22 + $0xb0] sm:$0x3f] }
  0x22   : > { %179 = vrot.lane.b32.xlu1 %v884_v4, %s792_s23  ;;  %177 = vrot.lane.b32.xlu0 %v887_v5, %s792_s23 }
  0x26   : > { %183 = vrot.lane.b32.xlu1 %v894_v6, %s792_s23  ;;  %181 = vrot.lane.b32.xlu0 %v897_v7, %s792_s23 }
  0x2a   : > { %187 = vrot.lane.b32.xlu1 %v904_v8, %s792_s23  ;;  %185 = vrot.lane.b32.xlu0 %v907_v9, %s792_s23 }
  0x2e   : > { %191 = vrot.lane.b32.xlu1 %v914_v10, %s792_s23  ;;  %189 = vrot.lane.b32.xlu0 %v917_v11, %s792_s23 }
  0x32   : > { %195 = vrot.lane.b32.xlu1 %v924_v12, %s792_s23  ;;  %193 = vrot.lane.b32.xlu0 %v927_v13, %s792_s23 }
  0x36   : > { %199 = vrot.lane.b32.xlu1 %v934_v14, %s792_s23  ;;  %197 = vrot.lane.b32.xlu0 %v937_v15, %s792_s23 }
  0x3a   : > { %203 = vrot.lane.b32.xlu1 %v944_v16, %s792_s23  ;;  %201 = vrot.lane.b32.xlu0 %v947_v17, %s792_s23 }
  0x3e   : > { %207 = vrot.lane.b32.xlu1 %v954_v18, %s792_s23  ;;  %205 = vrot.lane.b32.xlu0 %v957_v19, %s792_s23 }
  0x42   : > { %211 = vrot.lane.b32.xlu1 %v964_v20, %s792_s23  ;;  %209 = vrot.lane.b32.xlu0 %v967_v21, %s792_s23 }
  0x46   : > { %215 = vrot.lane.b32.xlu1 %v974_v22, %s792_s23  ;;  %213 = vrot.lane.b32.xlu0 %v977_v23, %s792_s23 }
  0x4a   : > { %243 = vrot.lane.b32.xlu1 %v877_v3, %s793_s24  ;;  %241 = vrot.lane.b32.xlu0 %v867_v1, %s793_s24 }
  0x4e   : > { %247 = vrot.lane.b32.xlu1 %v874_v2, %s793_s24  ;;  %245 = vrot.lane.b32.xlu0 %v864_v0, %s793_s24 }
  0x52   : > { %251 = vrot.lane.b32.xlu1 %v884_v4, %s793_s24  ;;  %249 = vrot.lane.b32.xlu0 %v887_v5, %s793_s24 }
  0x56   : > { %255 = vrot.lane.b32.xlu1 %v894_v6, %s793_s24  ;;  %253 = vrot.lane.b32.xlu0 %v897_v7, %s793_s24 }
  0x5a   : > { %259 = vrot.lane.b32.xlu1 %v904_v8, %s793_s24  ;;  %257 = vrot.lane.b32.xlu0 %v907_v9, %s793_s24 }
  0x5e   : > { %263 = vrot.lane.b32.xlu1 %v914_v10, %s793_s24  ;;  %261 = vrot.lane.b32.xlu0 %v917_v11, %s793_s24 }
  0x62   : > { %267 = vrot.lane.b32.xlu1 %v924_v12, %s793_s24  ;;  %265 = vrot.lane.b32.xlu0 %v927_v13, %s793_s24 }
  0x66   : > { %271 = vrot.lane.b32.xlu1 %v934_v14, %s793_s24  ;;  %269 = vrot.lane.b32.xlu0 %v937_v15, %s793_s24 }
  0x6a   : > { %275 = vrot.lane.b32.xlu1 %v944_v16, %s793_s24  ;;  %273 = vrot.lane.b32.xlu0 %v947_v17, %s793_s24 }
  0x6e   : > { %279 = vrot.lane.b32.xlu1 %v954_v18, %s793_s24  ;;  %277 = vrot.lane.b32.xlu0 %v957_v19, %s793_s24 }
  0x72   : > { %283 = vrot.lane.b32.xlu1 %v964_v20, %s793_s24  ;;  %281 = vrot.lane.b32.xlu0 %v967_v21, %s793_s24 }
  0x76   : > { %287 = vrot.lane.b32.xlu1 %v974_v22, %s793_s24  ;;  %285 = vrot.lane.b32.xlu0 %v977_v23, %s793_s24 }
  0x7a   : > { %315 = vrot.lane.b32.xlu1 %v877_v3, %s794_s25  ;;  %313 = vrot.lane.b32.xlu0 %v867_v1, %s794_s25 }
  0x7e   : > { %319 = vrot.lane.b32.xlu1 %v874_v2, %s794_s25  ;;  %317 = vrot.lane.b32.xlu0 %v864_v0, %s794_s25 }
  0x82   : > { %323 = vrot.lane.b32.xlu1 %v884_v4, %s794_s25  ;;  %321 = vrot.lane.b32.xlu0 %v887_v5, %s794_s25 }
  0x86   : > { %327 = vrot.lane.b32.xlu1 %v894_v6, %s794_s25  ;;  %325 = vrot.lane.b32.xlu0 %v897_v7, %s794_s25 }
  0x8a   : > { %331 = vrot.lane.b32.xlu1 %v904_v8, %s794_s25  ;;  %329 = vrot.lane.b32.xlu0 %v907_v9, %s794_s25 }
  0x8c   : > { %v1027_v24 = vpop.permute.xlu1 %173  ;;  %v1029_v25 = vpop.permute.xlu0 %169 }
  0x8e   : > { %335 = vrot.lane.b32.xlu1 %v914_v10, %s794_s25  ;;  %333 = vrot.lane.b32.xlu0 %v917_v11, %s794_s25 }
  0x90   : > { %v1035_v26 = vpop.permute.xlu1 %175  ;;  %v1037_v27 = vpop.permute.xlu0 %171 }
  0x92   : > { %339 = vrot.lane.b32.xlu1 %v924_v12, %s794_s25  ;;  %337 = vrot.lane.b32.xlu0 %v927_v13, %s794_s25 }
  0x94   : > { %v1043_v28 = vpop.permute.xlu1 %179  ;;  %v1045_v29 = vpop.permute.xlu0 %177 }
  0x96   : > { %343 = vrot.lane.b32.xlu1 %v934_v14, %s794_s25  ;;  %341 = vrot.lane.b32.xlu0 %v937_v15, %s794_s25 }
  0x98   : > { %v1052_v30 = vpop.permute.xlu1 %183  ;;  %v1054_v31 = vpop.permute.xlu0 %181 }
  0x9a   : > { %347 = vrot.lane.b32.xlu1 %v944_v16, %s794_s25  ;;  %345 = vrot.lane.b32.xlu0 %v947_v17, %s794_s25 }
  0x9c   : > { %v1062_v32 = vpop.permute.xlu1 %187  ;;  %v1064_v33 = vpop.permute.xlu0 %185 }
  0x9e   : > { %351 = vrot.lane.b32.xlu1 %v954_v18, %s794_s25  ;;  %349 = vrot.lane.b32.xlu0 %v957_v19, %s794_s25 }
  0xa0   : > { %v1088_v35 = vpop.permute.xlu1 %191  ;;  %v1090_v36 = vpop.permute.xlu0 %189 }
  0xa2   : > { %355 = vrot.lane.b32.xlu1 %v964_v20, %s794_s25  ;;  %353 = vrot.lane.b32.xlu0 %v967_v21, %s794_s25 }
  0xa4   : > { %v1096_v37 = vpop.permute.xlu1 %195  ;;  %v1098_v38 = vpop.permute.xlu0 %193 }
  0xa6   : > { %359 = vrot.lane.b32.xlu1 %v974_v22, %s794_s25  ;;  %357 = vrot.lane.b32.xlu0 %v977_v23, %s794_s25 }
  0xa8   : > { %v1104_v39 = vpop.permute.xlu1 %199  ;;  %v1106_v40 = vpop.permute.xlu0 %197 }
  0xac   : > { %v1108_v41 = vpop.permute.xlu1 %203  ;;  %v1110_v42 = vpop.permute.xlu0 %201 }
  0xb0   : > { %v1112_v43 = vpop.permute.xlu1 %207  ;;  %v1114_v44 = vpop.permute.xlu0 %205 }
  0xb4   : > { %v1116_v45 = vpop.permute.xlu1 %211  ;;  %v1118_v46 = vpop.permute.xlu0 %209 }
  0xb8   : > { %v1120_v47 = vpop.permute.xlu1 %215  ;;  %v1122_v48 = vpop.permute.xlu0 %213 }
  0xbc   : > { %v244_v49 = vpop.permute.xlu1 %243  ;;  %v242_v50 = vpop.permute.xlu0 %241 }
  0xbd   : > { %v387_v9 = vsel %vm385_vm1, %v1037_v27, %v244_v49  ;;  %v386_v10 = vsel %vm385_vm1, %v1029_v25, %v242_v50 }
  0xc0   : > { %v248_v51 = vpop.permute.xlu1 %247  ;;  %v246_v52 = vpop.permute.xlu0 %245 }
  0xc1   : > { %v389_v17 = vsel %vm385_vm1, %v1035_v26, %v248_v51  ;;  %v388_v18 = vsel %vm385_vm1, %v1027_v24, %v246_v52 }
  0xc4   : > { %v252_v53 = vpop.permute.xlu1 %251  ;;  %v250_v54 = vpop.permute.xlu0 %249 }
  0xc5   : > { %v391_v49 = vsel %vm385_vm1, %v1043_v28, %v252_v53  ;;  %v390_v50 = vsel %vm385_vm1, %v1045_v29, %v250_v54 }
  0xc8   : > { %v256_v55 = vpop.permute.xlu1 %255  ;;  %v254_v56 = vpop.permute.xlu0 %253 }
  0xc9   : > { %v393_v53 = vsel %vm385_vm1, %v1052_v30, %v256_v55  ;;  %v392_v54 = vsel %vm385_vm1, %v1054_v31, %v254_v56 }
  0xcc   : > { %v1124_v57 = vpop.permute.xlu1 %259  ;;  %v1126_v58 = vpop.permute.xlu0 %257 }
  0xcd   : > { %v395_v55 = vsel %vm385_vm1, %v1062_v32, %v1124_v57  ;;  %v394_v56 = vsel %vm385_vm1, %v1064_v33, %v1126_v58 }
  0xd0   : > { %v1128_v59 = vpop.permute.xlu1 %263  ;;  %v1130_v60 = vpop.permute.xlu0 %261 }
  0xd1   : > { %v397_v57 = vsel %vm385_vm1, %v1088_v35, %v1128_v59  ;;  %v396_v58 = vsel %vm385_vm1, %v1090_v36, %v1130_v60 }
  0xd4   : > { %v1132_v61 = vpop.permute.xlu1 %267  ;;  %v1134_v62 = vpop.permute.xlu0 %265 }
  0xd5   : > { %v399_v59 = vsel %vm385_vm1, %v1096_v37, %v1132_v61  ;;  %v398_v60 = vsel %vm385_vm1, %v1098_v38, %v1134_v62 }
  0xd8   : > { %v1136_v63 = vpop.permute.xlu1 %271  ;;  %v1138_v0 = vpop.permute.xlu0 %269 }
  0xd9   : > { %v401_v61 = vsel %vm385_vm1, %v1104_v39, %v1136_v63  ;;  %v400_v62 = vsel %vm385_vm1, %v1106_v40, %v1138_v0 }
  0xdc   : > { %v1140_v1 = vpop.permute.xlu1 %275  ;;  %v1142_v2 = vpop.permute.xlu0 %273 }
  0xdd   : > { %v403_v63 = vsel %vm385_vm1, %v1108_v41, %v1140_v1  ;;  %v402_v0 = vsel %vm385_vm1, %v1110_v42, %v1142_v2 }
  0xe0   : > { %v1144_v3 = vpop.permute.xlu1 %279  ;;  %v1146_v4 = vpop.permute.xlu0 %277 }
  0xe1   : > { %v405_v1 = vsel %vm385_vm1, %v1112_v43, %v1144_v3  ;;  %v404_v2 = vsel %vm385_vm1, %v1114_v44, %v1146_v4 }
  0xe4   : > { %v1148_v5 = vpop.permute.xlu1 %283  ;;  %v1150_v6 = vpop.permute.xlu0 %281 }
  0xe5   : > { %v407_v3 = vsel %vm385_vm1, %v1116_v45, %v1148_v5  ;;  %v406_v4 = vsel %vm385_vm1, %v1118_v46, %v1150_v6 }
  0xe8   : > { %v1152_v7 = vpop.permute.xlu1 %287  ;;  %v1154_v8 = vpop.permute.xlu0 %285 }
  0xe9   : > { %v409_v6 = vsel %vm385_vm1, %v1120_v47, %v1152_v7 }
  0xec   : > { %v316_v11 = vpop.permute.xlu1 %315  ;;  %v314_v12 = vpop.permute.xlu0 %313 }
  0xed   : > { %v412_v13 = vsel %vm410_vm2, %v387_v9, %v316_v11  ;;  %v411_v14 = vsel %vm410_vm2, %v386_v10, %v314_v12 }
  0xee   : > { %v460_v15 = vrot.slane %v412_v13, 7  ;;  %v459_v16 = vrot.slane %v411_v14, 7 }
  0xf0   : > { %v509_v19 = vsel %vm507_vm3, 0.0, %v460_v15  ;;  %v508_v20 = vsel %vm507_vm3, 0.0, %v459_v16  ;;  %v320_v21 = vpop.permute.xlu1 %319  ;;  %v318_v22 = vpop.permute.xlu0 %317 }
  0xf1   : > { %v534_v23 = vsel %vm532_vm4, %v509_v19, 0.0  ;;  %v533_v25 = vsel %vm532_vm4, %v508_v20, 0.0  ;;  %v414_v27 = vsel %vm410_vm2, %v389_v17, %v320_v21  ;;  %v413_v34 = vsel %vm410_vm2, %v388_v18, %v318_v22 }
  0xf2   : > { %560 = vst.msk [vmem:[%s1070_s28 + $0x10] sm:$0xff] %vm557_vm0, %v534_v23  ;;  %559 = vst.msk [vmem:[%s1070_s28 + $0x8] sm:$0xff] %vm557_vm0, %v533_v25  ;;  %v462_v24 = vrot.slane %v414_v27, 7  ;;  %v461_v26 = vrot.slane %v413_v34, 7 }
  0xf4   : > { %v511_v51 = vsel %vm507_vm3, 0.0, %v462_v24  ;;  %v510_v52 = vsel %vm507_vm3, 0.0, %v461_v26  ;;  %v324_v9 = vpop.permute.xlu1 %323  ;;  %v322_v10 = vpop.permute.xlu0 %321 }
  0xf5   : > { %v536_v11 = vsel %vm532_vm4, %v511_v51, 0.0  ;;  %v535_v12 = vsel %vm532_vm4, %v510_v52, 0.0  ;;  %v416_v13 = vsel %vm410_vm2, %v391_v49, %v324_v9  ;;  %v415_v14 = vsel %vm410_vm2, %v390_v50, %v322_v10 }
  0xf6   : > { %562 = vst.msk [vmem:[%s1070_s28 + $0x20] sm:$0xff] %vm557_vm0, %v536_v11  ;;  %561 = vst.msk [vmem:[%s1070_s28 + $0x18] sm:$0xff] %vm557_vm0, %v535_v12  ;;  %v464_v28 = vrot.slane %v416_v13, 7  ;;  %v463_v29 = vrot.slane %v415_v14, 7 }
  0xf8   : > { %v513_v15 = vsel %vm507_vm3, 0.0, %v464_v28  ;;  %v512_v16 = vsel %vm507_vm3, 0.0, %v463_v29  ;;  %v328_v17 = vpop.permute.xlu1 %327  ;;  %v326_v18 = vpop.permute.xlu0 %325 }
  0xf9   : > { %v538_v19 = vsel %vm532_vm4, %v513_v15, 0.0  ;;  %v537_v20 = vsel %vm532_vm4, %v512_v16, 0.0  ;;  %v418_v21 = vsel %vm410_vm2, %v393_v53, %v328_v17  ;;  %v417_v22 = vsel %vm410_vm2, %v392_v54, %v326_v18 }
  0xfa   : > { %564 = vst.msk [vmem:[%s1070_s28 + $0x30] sm:$0xff] %vm557_vm0, %v538_v19  ;;  %563 = vst.msk [vmem:[%s1070_s28 + $0x28] sm:$0xff] %vm557_vm0, %v537_v20  ;;  %v466_v30 = vrot.slane %v418_v21, 7  ;;  %v465_v31 = vrot.slane %v417_v22, 7 }
  0xfc   : > { %v515_v23 = vsel %vm507_vm3, 0.0, %v466_v30  ;;  %v514_v25 = vsel %vm507_vm3, 0.0, %v465_v31  ;;  %v332_v27 = vpop.permute.xlu1 %331  ;;  %v330_v34 = vpop.permute.xlu0 %329 }
  0xfd   : > { %v540_v24 = vsel %vm532_vm4, %v515_v23, 0.0  ;;  %v539_v26 = vsel %vm532_vm4, %v514_v25, 0.0  ;;  %v420_v49 = vsel %vm410_vm2, %v395_v55, %v332_v27  ;;  %v419_v50 = vsel %vm410_vm2, %v394_v56, %v330_v34 }
  0xfe   : > { %568 = vst.msk [vmem:[%s1070_s28 + $0x50] sm:$0xff] %vm557_vm0, %v540_v24  ;;  %567 = vst.msk [vmem:[%s1070_s28 + $0x48] sm:$0xff] %vm557_vm0, %v539_v26  ;;  %v468_v32 = vrot.slane %v420_v49, 7  ;;  %v467_v33 = vrot.slane %v419_v50, 7 }
 0x100   : > { %v517_v51 = vsel %vm507_vm3, 0.0, %v468_v32  ;;  %v516_v52 = vsel %vm507_vm3, 0.0, %v467_v33  ;;  %v336_v9 = vpop.permute.xlu1 %335  ;;  %v334_v10 = vpop.permute.xlu0 %333 }
 0x101   : > { %v542_v11 = vsel %vm532_vm4, %v517_v51, 0.0  ;;  %v541_v12 = vsel %vm532_vm4, %v516_v52, 0.0  ;;  %v422_v13 = vsel %vm410_vm2, %v397_v57, %v336_v9  ;;  %v421_v14 = vsel %vm410_vm2, %v396_v58, %v334_v10 }
 0x102   : > { %570 = vst.msk [vmem:[%s1070_s28 + $0x60] sm:$0xff] %vm557_vm0, %v542_v11  ;;  %569 = vst.msk [vmem:[%s1070_s28 + $0x58] sm:$0xff] %vm557_vm0, %v541_v12  ;;  %v470_v35 = vrot.slane %v422_v13, 7  ;;  %v469_v36 = vrot.slane %v421_v14, 7 }
 0x104   : > { %v519_v28 = vsel %vm507_vm3, 0.0, %v470_v35  ;;  %v518_v29 = vsel %vm507_vm3, 0.0, %v469_v36  ;;  %v340_v53 = vpop.permute.xlu1 %339  ;;  %v338_v54 = vpop.permute.xlu0 %337 }
 0x105   : > { %v544_v15 = vsel %vm532_vm4, %v519_v28, 0.0  ;;  %v543_v16 = vsel %vm532_vm4, %v518_v29, 0.0  ;;  %v424_v17 = vsel %vm410_vm2, %v399_v59, %v340_v53  ;;  %v423_v18 = vsel %vm410_vm2, %v398_v60, %v338_v54 }
 0x106   : > { %572 = vst.msk [vmem:[%s1070_s28 + $0x70] sm:$0xff] %vm557_vm0, %v544_v15  ;;  %571 = vst.msk [vmem:[%s1070_s28 + $0x68] sm:$0xff] %vm557_vm0, %v543_v16  ;;  %v472_v37 = vrot.slane %v424_v17, 7  ;;  %v471_v38 = vrot.slane %v423_v18, 7  ;;  %v408_v60 = vsel %vm385_vm1, %v1122_v48, %v1154_v8 }
 0x108   : > { %v521_v19 = vsel %vm507_vm3, 0.0, %v472_v37  ;;  %v520_v20 = vsel %vm507_vm3, 0.0, %v471_v38  ;;  %v344_v21 = vpop.permute.xlu1 %343  ;;  %v342_v22 = vpop.permute.xlu0 %341 }
 0x109   : > { %v546_v30 = vsel %vm532_vm4, %v521_v19, 0.0  ;;  %v545_v31 = vsel %vm532_vm4, %v520_v20, 0.0  ;;  %v426_v55 = vsel %vm410_vm2, %v401_v61, %v344_v21  ;;  %v425_v56 = vsel %vm410_vm2, %v400_v62, %v342_v22 }
 0x10a   : > { %576 = vst.msk [vmem:[%s1070_s28 + $0x90] sm:$0xff] %vm557_vm0, %v546_v30  ;;  %575 = vst.msk [vmem:[%s1070_s28 + $0x88] sm:$0xff] %vm557_vm0, %v545_v31  ;;  %v474_v39 = vrot.slane %v426_v55, 7  ;;  %v473_v40 = vrot.slane %v425_v56, 7 }
 0x10c   : > { %v523_v23 = vsel %vm507_vm3, 0.0, %v474_v39  ;;  %v522_v25 = vsel %vm507_vm3, 0.0, %v473_v40  ;;  %v348_v27 = vpop.permute.xlu1 %347  ;;  %v346_v34 = vpop.permute.xlu0 %345 }
 0x10d   : > { %v548_v24 = vsel %vm532_vm4, %v523_v23, 0.0  ;;  %v547_v26 = vsel %vm532_vm4, %v522_v25, 0.0  ;;  %v428_v49 = vsel %vm410_vm2, %v403_v63, %v348_v27  ;;  %v427_v50 = vsel %vm410_vm2, %v402_v0, %v346_v34 }
 0x10e   : > { %578 = vst.msk [vmem:[%s1070_s28 + $0xa0] sm:$0xff] %vm557_vm0, %v548_v24  ;;  %577 = vst.msk [vmem:[%s1070_s28 + $0x98] sm:$0xff] %vm557_vm0, %v547_v26  ;;  %v476_v41 = vrot.slane %v428_v49, 7  ;;  %v475_v42 = vrot.slane %v427_v50, 7 }
 0x110   : > { %v525_v32 = vsel %vm507_vm3, 0.0, %v476_v41  ;;  %v524_v33 = vsel %vm507_vm3, 0.0, %v475_v42  ;;  %v352_v57 = vpop.permute.xlu1 %351  ;;  %v350_v58 = vpop.permute.xlu0 %349 }
 0x111   : > { %v550_v51 = vsel %vm532_vm4, %v525_v32, 0.0  ;;  %v549_v52 = vsel %vm532_vm4, %v524_v33, 0.0  ;;  %v430_v9 = vsel %vm410_vm2, %v405_v1, %v352_v57  ;;  %v429_v10 = vsel %vm410_vm2, %v404_v2, %v350_v58 }
 0x112   : > { %580 = vst.msk [vmem:[%s1070_s28 + $0xb0] sm:$0xff] %vm557_vm0, %v550_v51  ;;  %579 = vst.msk [vmem:[%s1070_s28 + $0xa8] sm:$0xff] %vm557_vm0, %v549_v52  ;;  %v478_v43 = vrot.slane %v430_v9, 7  ;;  %v477_v44 = vrot.slane %v429_v10, 7 }
 0x114   : > { %v527_v11 = vsel %vm507_vm3, 0.0, %v478_v43  ;;  %v526_v12 = vsel %vm507_vm3, 0.0, %v477_v44  ;;  %v356_v13 = vpop.permute.xlu1 %355  ;;  %v354_v14 = vpop.permute.xlu0 %353 }
 0x115   : > { %v552_v35 = vsel %vm532_vm4, %v527_v11, 0.0  ;;  %v551_v36 = vsel %vm532_vm4, %v526_v12, 0.0  ;;  %v432_v59 = vsel %vm410_vm2, %v407_v3, %v356_v13  ;;  %v431_v45 = vsel %vm410_vm2, %v406_v4, %v354_v14 }
 0x116   : > { %584 = vst.msk [vmem:[%s1070_s28 + $0xd0] sm:$0xff] %vm557_vm0, %v552_v35  ;;  %583 = vst.msk [vmem:[%s1070_s28 + $0xc8] sm:$0xff] %vm557_vm0, %v551_v36  ;;  %v480_v46 = vrot.slane %v432_v59, 7  ;;  %v479_v5 = vrot.slane %v431_v45, 7 }
 0x118   : > { %v529_v28 = vsel %vm507_vm3, 0.0, %v480_v46  ;;  %v528_v29 = vsel %vm507_vm3, 0.0, %v479_v5  ;;  %v360_v53 = vpop.permute.xlu1 %359  ;;  %v358_v54 = vpop.permute.xlu0 %357 }
 0x119   : > { %v554_v15 = vsel %vm532_vm4, %v529_v28, 0.0  ;;  %v553_v16 = vsel %vm532_vm4, %v528_v29, 0.0  ;;  %v434_v47 = vsel %vm410_vm2, %v409_v6, %v360_v53  ;;  %v433_v7 = vsel %vm410_vm2, %v408_v60, %v358_v54 }
 0x11a   : > { %586 = vst.msk [vmem:[%s1070_s28 + $0xe0] sm:$0xff] %vm557_vm0, %v554_v15  ;;  %585 = vst.msk [vmem:[%s1070_s28 + $0xd8] sm:$0xff] %vm557_vm0, %v553_v16  ;;  %v482_v48 = vrot.slane %v434_v47, 7  ;;  %v481_v8 = vrot.slane %v433_v7, 7 }
 0x11c   : > { %v531_v17 = vsel %vm507_vm3, 0.0, %v482_v48  ;;  %v530_v18 = vsel %vm507_vm3, 0.0, %v481_v8 }
 0x11d   : > { %v556_v37 = vsel %vm532_vm4, %v531_v17, 0.0  ;;  %v555_v38 = vsel %vm532_vm4, %v530_v18, 0.0 }
 0x11e   : > { %588 = vst.msk [vmem:[%s1070_s28 + $0xf0] sm:$0xff] %vm557_vm0, %v556_v37  ;;  %587 = vst.msk [vmem:[%s1070_s28 + $0xe8] sm:$0xff] %vm557_vm0, %v555_v38 }
 0x11f   : > { %741 = shalt.err (!%p738_p3)
}
 0x120   : > { %s742_s18 = scalar_lea.hbm %s1337_s4, 4096  ;;  %s746_s21 = scalar_lea.hbm %s1393_s1, 8192 }
 0x121   : > { %p743_p4 = scmp.ne.s32.totalorder %s1337_s4, %s742_s18  ;;  %p747_p9 = scmp.lt.u32.totalorder %s1337_s4, %s1393_s1 }
 0x122   : > { %p748_p10 = scmp.lt.u32.totalorder %s746_s21, %s742_s18  ;;  %p750_p12 = scmp.lt.u32.totalorder %s742_s18, %s1337_s4 }
 0x123   : > { %p744_p7 = pnand %p743_p4, %p847_p5 }
 0x124   : > { %p749_p11 = por %p748_p10, %p747_p9 }
 0x125   : > { %p745_p8 = pneg %p744_p7 }
 0x126   : > { %p751_p13 = por %p750_p12, %p749_p11 }
 0x128   : > { %p752_p0 = pnand %p751_p13, %p745_p8 }
 0x12a   : > { %755 = shalt.err (!%p752_p0)
}
 0x12b   : > { %s797_s24 = smov 128   ;;  %s798_s25 = smov 8  }
 0x12c   : > { %683 = dma.vmem_to_hbm [thread:$0]  (%p847_p5), %s1339_s30, 4096, %s1337_s4, %s1351_s5, %s797_s24, %s797_s24, %s798_s25  }
 0x12d PF: > { %p689_p1 = scmp.ge.s32.totalorder %s790_s9, 2  ;;  %s620_s26 = sand.u32 1, %s778_s6  }
 0x12e   : > { %s621_s27 = scalar_lea.sflag [#allocation3], %s620_s26 }
 0x12f   : > { %p686_p2 = pnand %p689_p1, %p851_p6 }
 0x131   : > { %773 = dma.done.wait (!%p686_p2), %s621_s27, 4096  }
 0x132   : > { %775 = vsyncadd (!%p686_p2), %s621_s27, 4294963200  ;;  %p11_p3 = scmp.ge.s32.totalorder %s834_s12, 4   ;;  %s1396_s6 = smov %s782_s7 }
 0x133   : > { %s1397_s7 = smov %s786_s8  ;;  %s1398_s8 = smov %s845_s15 }
 0x134   : > { %s1399_s9 = smov %s834_s12  ;;  %13 = sbr.rel (!%p11_p3) target bundleno = 3 (0x3), region = 59 }
 0x13b   :  { %626 = vsyncpa [#allocation3], 1 }
 0x13c   :  { %628 = vsyncpa [#allocation3 + $0x1], 1 }

</bundles_post_ra>
